<compile_context>
chip_gen: v5e
topology: v5e:2x2
jax: 0.10.0
libtpu: 0.0.40
codegen_flags: <defaults>
</compile_context>

<pallas_src>
import functools

import jax
import jax.numpy as jnp
from jax.experimental import pallas as pl
from jax.experimental.pallas import tpu as pltpu

LANES = 128                 # lane width (last dim of the slab)
MAX_ROW_TILE = 2048         # rows per block: 2048*128*4B = 1 MiB per input
NUM_CORE_SPLITS = 2         # leading "parallel" axis (v7x has 2 TCs/chip)
PALLAS_MIN_ELEMS = 1 << 16  # below this, plain XLA is faster than dispatch


def _partial_sse_kernel(x_ref, y_ref, out_ref, acc_ref, *,
                        total_rows, row_tile, steps_per_core, need_mask):
    """Per-core partial sum of squared differences.

    grid = (splits, steps_per_core); axis 0 is parallel, axis 1 is the
    reduction. out_ref: (1, 1) SMEM block per core (written once, in the
    epilogue). acc_ref: (8, LANES) f32 VMEM scratch accumulator.
    """
    c = pl.program_id(0)
    i = pl.program_id(1)

    @pl.when(i == 0)
    def _init():
        acc_ref[...] = jnp.zeros_like(acc_ref)

    d = x_ref[...].astype(jnp.float32) - y_ref[...].astype(jnp.float32)
    sq = d * d

    if need_mask:
        # Zero rows whose *logical* index falls past the end of the slab
        # (ragged last block and/or clamped overshoot of the core split).
        base = (c * steps_per_core + i) * row_tile
        row_ids = base + jax.lax.broadcasted_iota(
            jnp.int32, (row_tile, LANES), 0)
        sq = jnp.where(row_ids < total_rows, sq, 0.0)

    if row_tile % 8 == 0:
        # Collapse rows 8-at-a-time: pure vreg-wise VPU adds, no XLU work in
        # the steady-state loop.
        acc_ref[...] += sq.reshape(row_tile // 8, 8, LANES).sum(axis=0)
    else:
        # Only reachable for tiny, non-8-aligned slabs (single-step grids).
        acc_ref[0:1, :] += jnp.sum(sq, axis=0, keepdims=True)

    @pl.when(i == pl.num_programs(1) - 1)
    def _finalize():
        out_ref[0, 0] = jnp.sum(acc_ref[...])


def _sum_squared_error(x2d, y2d):
    """x2d, y2d: (rows, 128) arrays. Returns scalar f32 sum((x - y)^2)."""
    rows = x2d.shape[0]
    assert x2d.shape == y2d.shape and x2d.shape[1] == LANES

    # A full-extent block is always legal; otherwise an 8-aligned 1 MiB tile.
    row_tile = rows if rows <= MAX_ROW_TILE else MAX_ROW_TILE
    num_blocks = -(-rows // row_tile)                    # cdiv
    splits = min(NUM_CORE_SPLITS, num_blocks)
    steps_per_core = -(-num_blocks // splits)            # cdiv
    need_mask = (rows % row_tile != 0) or (splits * steps_per_core != num_blocks)
    last_block = num_blocks - 1

    def in_index(c, i):
        blk = c * steps_per_core + i
        if need_mask:
            # Never ask for a block that starts fully past the array end;
            # the re-read data is masked to zero in-kernel.
            blk = jnp.minimum(blk, last_block)
        return (blk, 0)

    kernel = functools.partial(
        _partial_sse_kernel,
        total_rows=rows, row_tile=row_tile,
        steps_per_core=steps_per_core, need_mask=need_mask)

    n_elems = x2d.size
    bytes_accessed = n_elems * (x2d.dtype.itemsize + y2d.dtype.itemsize) + 4 * splits

    partials = pl.pallas_call(
        kernel,
        out_shape=jax.ShapeDtypeStruct((splits, 1), jnp.float32),
        grid_spec=pltpu.PrefetchScalarGridSpec(
            num_scalar_prefetch=0,
            grid=(splits, steps_per_core),
            in_specs=[
                pl.BlockSpec((row_tile, LANES), in_index),
                pl.BlockSpec((row_tile, LANES), in_index),
            ],
            out_specs=pl.BlockSpec((1, 1), lambda c, i: (c, 0),
                                   memory_space=pltpu.SMEM),
            scratch_shapes=[pltpu.VMEM((8, LANES), jnp.float32)],
        ),
        compiler_params=pltpu.CompilerParams(
            dimension_semantics=("parallel", "arbitrary"),
        ),
        cost_estimate=pl.CostEstimate(
            flops=3 * n_elems, transcendentals=0,
            bytes_accessed=bytes_accessed),
    )(x2d, y2d)
    return jnp.sum(partials)


def vae_loss(outputs, target, lam=0.1, *, force_pallas=False):
    """Pallas-backed equivalent of VAELoss(λ=lam).forward(outputs, target)."""
    output, vq_loss = outputs
    n_elems = output.size
    vq = jnp.asarray(vq_loss, dtype=jnp.float32)

    use_pallas = force_pallas or n_elems >= PALLAS_MIN_ELEMS
    if n_elems % LANES != 0:
        # TODO(synk): handle the lane remainder with in-kernel masking instead
        # of falling back to XLA for lane-ragged element counts.
        use_pallas = False

    if use_pallas:
        x2d = output.reshape(-1, LANES)
        y2d = target.reshape(-1, LANES)
        sse = _sum_squared_error(x2d, y2d)
        reconst_loss = sse / jnp.float32(n_elems)        # nn.MSELoss(): mean
    else:
        diff = output.astype(jnp.float32) - target.astype(jnp.float32)
        reconst_loss = jnp.mean(diff * diff)

    loss = reconst_loss + jnp.float32(lam) * vq
    return {"loss": loss, "reconstruction loss": reconst_loss, "VQ loss": vq}


if __name__ == "__main__":
    key = jax.random.PRNGKey(0)
    k1, k2, k3, k4, k5 = jax.random.split(key, 5)

    # --- Case 1: small VAE-decoder-like NCHW output [2, 4, 16, 16] ----------
    B, C, H, W = 2, 4, 16, 16
    out_small = jax.random.normal(k1, (B, C, H, W), dtype=jnp.float32)
    tgt_small = jax.random.normal(k2, (B, C, H, W), dtype=jnp.float32)
    vq_small = jax.random.uniform(k3, (), dtype=jnp.float32)

    # force_pallas=True exercises the kernel even though this tensor is tiny.
    res = vae_loss((out_small, vq_small), tgt_small, lam=0.1, force_pallas=True)
    res = jax.tree_util.tree_map(jax.block_until_ready, res)

    ref_rec = jnp.mean((out_small - tgt_small) ** 2)
    ref_loss = ref_rec + 0.1 * vq_small
    assert jnp.allclose(res["reconstruction loss"], ref_rec, rtol=1e-5, atol=1e-6)
    assert jnp.allclose(res["loss"], ref_loss, rtol=1e-5, atol=1e-6)
    assert jnp.allclose(res["VQ loss"], vq_small, rtol=1e-6, atol=1e-7)

    # Default path for the tiny tensor (XLA fallback) must agree as well.
    res_fb = vae_loss((out_small, vq_small), tgt_small, lam=0.1)
    res_fb = jax.tree_util.tree_map(jax.block_until_ready, res_fb)
    assert jnp.allclose(res_fb["loss"], res["loss"], rtol=1e-5, atol=1e-6)

    # --- Case 2: modest tensor that takes the Pallas path by default --------
    # rows = 4*8*96*96/128 = 2304 -> blocks of 2048 rows, ragged last block,
    # 2-way core split: exercises accumulation, masking, and partial combine.
    B2, C2, H2, W2 = 4, 8, 96, 96
    out_big = jax.random.normal(k4, (B2, C2, H2, W2), dtype=jnp.float32)
    tgt_big = jax.random.normal(k5, (B2, C2, H2, W2), dtype=jnp.float32)
    vq_big = jnp.float32(0.25)

    res2 = vae_loss((out_big, vq_big), tgt_big, lam=0.1)
    res2 = jax.tree_util.tree_map(jax.block_until_ready, res2)

    ref_rec2 = jnp.mean((out_big - tgt_big) ** 2)
    ref_loss2 = ref_rec2 + 0.1 * vq_big
    assert jnp.allclose(res2["reconstruction loss"], ref_rec2, rtol=2e-4, atol=1e-6)
    assert jnp.allclose(res2["loss"], ref_loss2, rtol=2e-4, atol=1e-6)

    print("KERNEL_OK")
</pallas_src>

<mosaic_0001>
module attributes {stable_mosaic.version = 11 : i64} {
  func.func @_partial_sse_kernel(%arg0: i32, %arg1: i32, %arg2: memref<16x128xf32, #tpu.memory_space<vmem>>, %arg3: memref<16x128xf32, #tpu.memory_space<vmem>>, %arg4: memref<1x1xf32, #tpu.memory_space<smem>>, %arg5: memref<8x128xf32, #tpu.memory_space<vmem>>) attributes {dimension_semantics = [#tpu.dimension_semantics<parallel>, #tpu.dimension_semantics<arbitrary>], iteration_bounds = array<i64: 1, 1>, scalar_prefetch = 0 : i64, scratch_operands = 1 : i64, tpu.core_type = #tpu.core_type<tc>, window_params = [{transform_indices = @transform_0, window_bounds = array<i64: 16, 128>}, {transform_indices = @transform_1, window_bounds = array<i64: 16, 128>}, {transform_indices = @transform_2, window_bounds = array<i64: 1, 1>}]} {
    %c0_i32 = arith.constant 0 : i32
    %0 = arith.cmpi eq, %arg1, %c0_i32 : i32
    %1 = arith.extui %0 : i1 to i32
    %c0_i32_0 = arith.constant 0 : i32
    %2 = arith.cmpi ne, %1, %c0_i32_0 : i32
    scf.if %2 {
      %cst_10 = arith.constant 0.000000e+00 : f32
      %15 = vector.broadcast %cst_10 : f32 to vector<8x128xf32>
      %c0_11 = arith.constant 0 : index
      %c0_12 = arith.constant 0 : index
      %16 = vector.load %arg5[%c0_11, %c0_12] : memref<8x128xf32, #tpu.memory_space<vmem>>, vector<8x128xf32>
      tpu.vector_store %arg5[%c0_11, %c0_12], %15 {strides = array<i32>} : memref<8x128xf32, #tpu.memory_space<vmem>>, vector<8x128xf32>,
    } else {
    }
    %c0 = arith.constant 0 : index
    %c0_1 = arith.constant 0 : index
    %3 = vector.load %arg2[%c0, %c0_1] : memref<16x128xf32, #tpu.memory_space<vmem>>, vector<16x128xf32>
    %c0_2 = arith.constant 0 : index
    %c0_3 = arith.constant 0 : index
    %4 = vector.load %arg3[%c0_2, %c0_3] : memref<16x128xf32, #tpu.memory_space<vmem>>, vector<16x128xf32>
    %5 = arith.subf %3, %4 : vector<16x128xf32>
    %6 = arith.mulf %5, %5 : vector<16x128xf32>
    %c0_4 = arith.constant 0 : index
    %c0_5 = arith.constant 0 : index
    %7 = vector.load %arg5[%c0_4, %c0_5] : memref<8x128xf32, #tpu.memory_space<vmem>>, vector<8x128xf32>
    %8 = vector.shape_cast %6 : vector<16x128xf32> to vector<2x8x128xf32>
    %cst = arith.constant dense<0.000000e+00> : vector<8x128xf32>
    %9 = vector.multi_reduction <add>, %8, %cst [0] : vector<2x8x128xf32> to vector<8x128xf32>
    %10 = arith.addf %7, %9 : vector<8x128xf32>
    %c0_6 = arith.constant 0 : index
    %c0_7 = arith.constant 0 : index
    %11 = vector.load %arg5[%c0_6, %c0_7] : memref<8x128xf32, #tpu.memory_space<vmem>>, vector<8x128xf32>
    tpu.vector_store %arg5[%c0_6, %c0_7], %10 {strides = array<i32>} : memref<8x128xf32, #tpu.memory_space<vmem>>, vector<8x128xf32>,
    %c0_i32_8 = arith.constant 0 : i32
    %12 = arith.cmpi eq, %arg1, %c0_i32_8 : i32
    %13 = arith.extui %12 : i1 to i32
    %c0_i32_9 = arith.constant 0 : i32
    %14 = arith.cmpi ne, %13, %c0_i32_9 : i32
    scf.if %14 {
      %c0_10 = arith.constant 0 : index
      %c0_11 = arith.constant 0 : index
      %15 = vector.load %arg5[%c0_10, %c0_11] : memref<8x128xf32, #tpu.memory_space<vmem>>, vector<8x128xf32>
      %16 = vector.shape_cast %15 : vector<8x128xf32> to vector<1x8x128xf32>
      %cst_12 = arith.constant dense<0.000000e+00> : vector<1xf32>
      %17 = vector.multi_reduction <add>, %16, %cst_12 [1, 2] : vector<1x8x128xf32> to vector<1xf32>
      %18 = vector.shape_cast %17 : vector<1xf32> to vector<1x1x1xf32>
      %19 = vector.extract %18[0, 0, 0] : f32 from vector<1x1x1xf32>
      %c0_13 = arith.constant 0 : index
      %c0_14 = arith.constant 0 : index
      %20 = memref.load %arg4[%c0_13, %c0_14] : memref<1x1xf32, #tpu.memory_space<smem>>
      memref.store %19, %arg4[%c0_13, %c0_14] : memref<1x1xf32, #tpu.memory_space<smem>>
    } else {
    }
    return
  }
  func.func @transform_0(%arg0: i32, %arg1: i32) -> (i32, i32) {
    %c1_i32 = arith.constant 1 : i32
    %0 = arith.muli %arg0, %c1_i32 : i32
    %1 = arith.addi %0, %arg1 : i32
    %c0_i32 = arith.constant 0 : i32
    %c0_i32_0 = arith.constant 0 : i32
    return %1, %c0_i32 : i32, i32
  }
  func.func @transform_1(%arg0: i32, %arg1: i32) -> (i32, i32) {
    %c1_i32 = arith.constant 1 : i32
    %0 = arith.muli %arg0, %c1_i32 : i32
    %1 = arith.addi %0, %arg1 : i32
    %c0_i32 = arith.constant 0 : i32
    %c0_i32_0 = arith.constant 0 : i32
    return %1, %c0_i32 : i32, i32
  }
  func.func @transform_2(%arg0: i32, %arg1: i32) -> (i32, i32) {
    %c0_i32 = arith.constant 0 : i32
    %c0_i32_0 = arith.constant 0 : i32
    return %arg0, %c0_i32 : i32, i32
  }
}

</mosaic_0001>

<bundles_post_ra>
// kernel: tpu_custom_call.1
= control target key start
LH: loop header
LB: loop body
LE: loop exit
PB: predicated region body
PF: predicated region fallthrough
CT: control target
= control target key end

     0   :  { %7 = vsyncpa [#allocation4], 0  ;;  %s207_s0 = inlined_call_operand.hbm [shape: f32[16,128], index: 0, kind: input, shape index: {}]   ;;  %s208_s1 = inlined_call_operand.hbm [shape: f32[16,128], index: 1, kind: input, shape index: {}]   ;;  %s209_s2 = inlined_call_operand.hbm [shape: f32[1,1], index: 2, kind: output, shape index: {}]  }
   0x1   :  { %8 = vsyncpa [#allocation7], 0 }
   0x2   :  { %9 = vsyncpa [#allocation5], 0  ;;  %s18_s11 = sshll.u32 %s207_s0, 4  ;;  %s178_s12 = smov [#allocation3]   ;;  %s19_s11 = int_to_ptr.hbm [resolvable:$true] %s18_s11 }
   0x3   :  { %s20_s13 = sshll.u32 %s178_s12, 4  ;;  %s35_s16 = sshll.u32 %s208_s1, 4  ;;  %s21_s13 = int_to_ptr.vmem [resolvable:$true] %s20_s13  ;;  %s36_s16 = int_to_ptr.hbm [resolvable:$true] %s35_s16 }
   0x4   :  { %s179_s17 = smov 128   ;;  %s180_s18 = smov 8  }
   0x5   :  { %26 = dma.hbm_to_vmem [thread:$0]  %s19_s11, 256, %s21_s13, [#allocation4], %s179_s17, %s179_s17, %s180_s18  }
   0x6   :  { %s181_s19 = smov [#allocation6]  }
   0x7   :  { %s37_s20 = sshll.u32 %s181_s19, 4  ;;  %s38_s20 = int_to_ptr.vmem [resolvable:$true] %s37_s20 }
   0x8   :  { %43 = dma.hbm_to_vmem [thread:$0]  %s36_s16, 256, %s38_s20, [#allocation7], %s179_s17, %s179_s17, %s180_s18  }
   0x9   :  { %172 = dma.done.wait [#allocation4], 256  }
   0xa   :  { %173 = vsyncadd [#allocation4], 4294967040 }
   0xb   :  { %174 = dma.done.wait [#allocation7], 256  }
   0xc   :  { %175 = vsyncadd [#allocation7], 4294967040  ;;  %v61_v0 = vld [vmem:[#allocation3] sm:$0xff]  ;;  %v62_v1 = vld [vmem:[#allocation3 + $0x8] sm:$0xff]  ;;  %s93_s21 = sshll.u32 %s209_s2, 4  ;;  %s182_s23 = smov [#allocation8]   ;;  %s94_s21 = int_to_ptr.hbm [resolvable:$true] %s93_s21 }
   0xd   :  { %v63_v2 = vld [vmem:[#allocation6] sm:$0xff]  ;;  %v64_v3 = vld [vmem:[#allocation6 + $0x8] sm:$0xff] }
   0xe   :  { %v65_v4 = vsub.f32 %v61_v0, %v63_v2  ;;  %v66_v5 = vsub.f32 %v62_v1, %v64_v3 }
  0x10   :  { %v67_v6 = vmul.f32 %v65_v4, %v65_v4  ;;  %v68_v7 = vmul.f32 %v66_v5, %v66_v5 }
  0x12   :  { %v70_v8 = vadd.f32 %v68_v7, %v67_v6 }
  0x14   :  { %77 = vadd.xlane.f32.xlu0 %v70_v8 }
  0x87   :  { %v78_v9 = vpop.xlane.xlu0 %77 }
  0x88   :  { %v79_v10 = vrot.slane %v78_v9, 4 }
  0x8a   :  { %v80_v11 = vadd.f32 %v79_v10, %v78_v9 }
  0x8c   :  { %v81_v12 = vrot.slane %v80_v11, 2 }
  0x8e   :  { %v82_v13 = vadd.f32 %v81_v12, %v80_v11 }
  0x90   :  { %v83_v14 = vrot.slane %v82_v13, 1 }
  0x92   :  { %v84_v15 = vadd.f32 %v83_v14, %v82_v13 }
  0x94   :  { %105 = vpush %v84_v15 }
  0xc5   :  { %s106_s22 = spop %105 }
  0xc6   :  { %87 = sst [smem:[#allocation8]] %s106_s22 }
  0xc7   :  { %96 = dma.smem_to_hbm %s182_s23, 16, %s94_s21, [#allocation5]  }
  0xc8   :  { %176 = dma.done.wait [#allocation5], 16  }
  0xc9   :  { %177 = vsyncadd [#allocation5], 4294967280 }
  0xca   :  { %101 = sfence }
  0xcb   :  { %102 = vsyncpa [#allocation4], 1 }
  0xcc   :  { %103 = vsyncpa [#allocation7], 1 }
  0xcd   :  { %104 = vsyncpa [#allocation5], 1 }

</bundles_post_ra>
